<compile_context>
chip_gen: v7x
topology: tpu7x:2x2x1
jax: 0.10.0
libtpu: 0.0.40
codegen_flags: <defaults>
</compile_context>

<pallas_src>
import jax
import jax.numpy as jnp
from jax.experimental import pallas as pl
from jax.experimental.pallas import tpu as pltpu

D_IN = 784          # Fashion-MNIST flattened 28x28 (full last dim of x; no pad)
HID_PAD = 128       # hidden widths 64/128 padded to 128 lanes
OUT_PAD = 128       # output width 10 padded to 128 lanes (unmasked stores)


def _round_up(n, m):
    return (n + m - 1) // m * m


# ---------------------------------------------------------------------------
# Kernel: one batch tile, all five layers fused. Weights/activations bf16,
# accumulation + bias-add + ReLU in f32.
# ---------------------------------------------------------------------------
def fmnist_dense_kernel(
    x_ref,
    w1_ref, b1_ref,
    w2_ref, b2_ref,
    w3_ref, b3_ref,
    w4_ref, b4_ref,
    w5_ref, b5_ref,
    o_ref,
):
    # Cast to bf16 inside the kernel (no separate host-side cast/pad pass).
    h = x_ref[...].astype(jnp.bfloat16)

    h = jnp.dot(h, w1_ref[...], preferred_element_type=jnp.float32) + b1_ref[...]
    h = jnp.maximum(h, 0.0).astype(jnp.bfloat16)

    h = jnp.dot(h, w2_ref[...], preferred_element_type=jnp.float32) + b2_ref[...]
    h = jnp.maximum(h, 0.0).astype(jnp.bfloat16)

    h = jnp.dot(h, w3_ref[...], preferred_element_type=jnp.float32) + b3_ref[...]
    h = jnp.maximum(h, 0.0).astype(jnp.bfloat16)

    h = jnp.dot(h, w4_ref[...], preferred_element_type=jnp.float32) + b4_ref[...]
    h = jnp.maximum(h, 0.0).astype(jnp.bfloat16)

    # Output layer: no activation (matches PyTorch forward).
    out = jnp.dot(h, w5_ref[...], preferred_element_type=jnp.float32) + b5_ref[...]
    o_ref[...] = out.astype(o_ref.dtype)


# ---------------------------------------------------------------------------
# Packing: zero-pad weights/biases to lane-multiple output widths (hidden and
# output dims -> 128).  W1 keeps its natural K = 784.  Weights -> bf16,
# biases stay f32 (tiny; added on the f32 accumulator).
# ---------------------------------------------------------------------------
def pack_params(params):
    in_pads = [D_IN, HID_PAD, HID_PAD, HID_PAD, HID_PAD]
    packed = []
    for idx, (w, b) in enumerate(params):
        fin, fout = w.shape
        wp = jnp.zeros((in_pads[idx], HID_PAD), jnp.float32).at[:fin, :fout].set(w)
        bp = jnp.zeros((1, HID_PAD), jnp.float32).at[0, :fout].set(b)
        packed.append((wp.astype(jnp.bfloat16), bp))
    return packed


def _pick_b_tile(B, b_tile):
    b_tile = max(8, _round_up(int(b_tile), 8))
    # VMEM headroom (v7x: 64 MiB physical / 32 MiB scoped). At 2048 rows the
    # double-buffered f32 x tile is ~15 MiB total with output + weights.
    b_tile = min(b_tile, 2048)
    # Never larger than the (sublane-rounded) batch.
    b_tile = min(b_tile, _round_up(max(B, 1), 8))
    # Keep >= 2 grid steps when the batch allows it so v7x's two TensorCores
    # both get work under dimension_semantics=("parallel",).
    if B > 8:
        b_tile = min(b_tile, _round_up((B + 1) // 2, 8))
    return b_tile


def fmnist_dense_forward(x, params, *, b_tile=1024):
    """x: [B, 784] float32 (or bfloat16). params: list of (W [in,out], b [out]) f32."""
    B, d_in = x.shape
    assert d_in == D_IN
    d_out = params[-1][0].shape[1]

    packed = pack_params(params)
    b_tile = _pick_b_tile(B, b_tile)
    grid = (pl.cdiv(B, b_tile),)   # partial last block handled by Pallas masking

    flat_args = [x]
    # x block: (b_tile, 784) — 784 equals the full last dim, so it is legal
    # even though it is not a multiple of 128.
    in_specs = [pl.BlockSpec((b_tile, D_IN), lambda i: (i, 0))]

    weight_bytes = 0
    for w, b in packed:
        flat_args.append(w)
        flat_args.append(b)
        # Constant index_map + single buffering -> weights stay resident in
        # VMEM, fetched once, no double-buffer.
        in_specs.append(
            pl.BlockSpec(w.shape, lambda i: (0, 0), pipeline_mode=pl.Buffered(1))
        )
        in_specs.append(
            pl.BlockSpec(b.shape, lambda i: (0, 0), pipeline_mode=pl.Buffered(1))
        )
        weight_bytes += w.size * w.dtype.itemsize + b.size * b.dtype.itemsize

    # Advisory cost estimate reflecting actual kernel traffic.
    flops = 2 * B * (D_IN * HID_PAD + 3 * HID_PAD * HID_PAD + HID_PAD * OUT_PAD)
    bytes_accessed = (
        B * D_IN * x.dtype.itemsize      # input read (no host pad pass)
        + weight_bytes                   # resident bf16 weights + f32 biases
        + B * OUT_PAD * 2                # bf16 output
    )

    out_padded = pl.pallas_call(
        fmnist_dense_kernel,
        out_shape=jax.ShapeDtypeStruct((B, OUT_PAD), jnp.bfloat16),
        grid=grid,
        in_specs=in_specs,
        out_specs=pl.BlockSpec((b_tile, OUT_PAD), lambda i: (i, 0)),
        compiler_params=pltpu.CompilerParams(
            dimension_semantics=("parallel",),
        ),
        cost_estimate=pl.CostEstimate(
            flops=flops, transcendentals=0, bytes_accessed=bytes_accessed
        ),
    )(*flat_args)

    # Slice the logical logits and upcast the tiny [B, 10] result to f32.
    return out_padded[:, :d_out].astype(jnp.float32)


# ---------------------------------------------------------------------------
# Parameter init + references
# ---------------------------------------------------------------------------
def init_params(key, d_in, d_out):
    """Deterministic synthetic init matching nn.Linear layer shapes (W stored [in,out])."""
    dims = [d_in, 64, 128, 128, 64, d_out]
    params = []
    for i in range(len(dims) - 1):
        key, kw, kb = jax.random.split(key, 3)
        fan_in, fan_out = dims[i], dims[i + 1]
        bound = 1.0 / jnp.sqrt(jnp.float32(fan_in))
        w = jax.random.uniform(kw, (fan_in, fan_out), jnp.float32, -bound, bound)
        b = jax.random.uniform(kb, (fan_out,), jnp.float32, -bound, bound)
        params.append((w, b))
    return params


def reference_forward_f32(x, params):
    """Plain-JAX f32 reference (matches the PyTorch module's math)."""
    h = x
    for i, (w, b) in enumerate(params):
        h = h @ w + b
        if i < len(params) - 1:
            h = jnp.maximum(h, 0.0)
    return h


def reference_forward_bf16(x, params):
    """Plain-JAX reference mirroring the kernel's numerics (bf16 in/out, f32 acc)."""
    h = x.astype(jnp.bfloat16)
    n = len(params)
    for i, (w, b) in enumerate(params):
        h = jnp.dot(h, w.astype(jnp.bfloat16), preferred_element_type=jnp.float32) + b
        if i < n - 1:
            h = jnp.maximum(h, 0.0).astype(jnp.bfloat16)
    return h.astype(jnp.bfloat16).astype(jnp.float32)


if __name__ == "__main__":
    D_OUT = 10

    key = jax.random.PRNGKey(0)
    key, kp = jax.random.split(key)
    params = init_params(kp, D_IN, D_OUT)

    # Case 1: batch divisible by the chosen tile (B=64 -> b_tile=32, 2 grid steps).
    key, k1 = jax.random.split(key)
    x1 = jax.random.normal(k1, (64, D_IN), jnp.float32)
    out1 = jax.block_until_ready(fmnist_dense_forward(x1, params))
    assert out1.shape == (64, D_OUT)

    # Case 2: batch NOT divisible by the tile (B=20 -> b_tile=16, partial last block).
    key, k2 = jax.random.split(key)
    x2 = jax.random.normal(k2, (20, D_IN), jnp.float32)
    out2 = jax.block_until_ready(fmnist_dense_forward(x2, params))
    assert out2.shape == (20, D_OUT)

    for x, out in ((x1, out1), (x2, out2)):
        ref_bf16 = reference_forward_bf16(x, params)
        ref_f32 = reference_forward_f32(x, params)
        # Tight check vs. a reference mirroring the kernel's bf16/f32 numerics.
        assert jnp.allclose(out, ref_bf16, atol=2e-2, rtol=2e-2), "mismatch vs bf16 reference"
        # Loose sanity check vs. the full-f32 reference (bf16 rounding tolerance).
        assert jnp.allclose(out, ref_f32, atol=1.5e-1, rtol=1.5e-1), "mismatch vs f32 reference"

    print("KERNEL_OK")
</pallas_src>

<mosaic_0001>
module attributes {stable_mosaic.version = 11 : i64} {
  func.func @fmnist_dense_kernel(%arg0: i32, %arg1: memref<32x784xf32, #tpu.memory_space<vmem>>, %arg2: memref<784x128xbf16, #tpu.memory_space<vmem>>, %arg3: memref<1x128xf32, #tpu.memory_space<vmem>>, %arg4: memref<128x128xbf16, #tpu.memory_space<vmem>>, %arg5: memref<1x128xf32, #tpu.memory_space<vmem>>, %arg6: memref<128x128xbf16, #tpu.memory_space<vmem>>, %arg7: memref<1x128xf32, #tpu.memory_space<vmem>>, %arg8: memref<128x128xbf16, #tpu.memory_space<vmem>>, %arg9: memref<1x128xf32, #tpu.memory_space<vmem>>, %arg10: memref<128x128xbf16, #tpu.memory_space<vmem>>, %arg11: memref<1x128xf32, #tpu.memory_space<vmem>>, %arg12: memref<32x128xbf16, #tpu.memory_space<vmem>>) attributes {dimension_semantics = [#tpu.dimension_semantics<parallel>], iteration_bounds = array<i64: 2>, scalar_prefetch = 0 : i64, scratch_operands = 0 : i64, tpu.core_type = #tpu.core_type<tc>, window_params = [{transform_indices = @transform_0, window_bounds = array<i64: 32, 784>}, {pipeline_mode = #tpu.pipeline_mode<synchronous>, transform_indices = @transform_1, window_bounds = array<i64: 784, 128>}, {pipeline_mode = #tpu.pipeline_mode<synchronous>, transform_indices = @transform_2, window_bounds = array<i64: 1, 128>}, {pipeline_mode = #tpu.pipeline_mode<synchronous>, transform_indices = @transform_3, window_bounds = array<i64: 128, 128>}, {pipeline_mode = #tpu.pipeline_mode<synchronous>, transform_indices = @transform_4, window_bounds = array<i64: 1, 128>}, {pipeline_mode = #tpu.pipeline_mode<synchronous>, transform_indices = @transform_5, window_bounds = array<i64: 128, 128>}, {pipeline_mode = #tpu.pipeline_mode<synchronous>, transform_indices = @transform_6, window_bounds = array<i64: 1, 128>}, {pipeline_mode = #tpu.pipeline_mode<synchronous>, transform_indices = @transform_7, window_bounds = array<i64: 128, 128>}, {pipeline_mode = #tpu.pipeline_mode<synchronous>, transform_indices = @transform_8, window_bounds = array<i64: 1, 128>}, {pipeline_mode = #tpu.pipeline_mode<synchronous>, transform_indices = @transform_9, window_bounds = array<i64: 128, 128>}, {pipeline_mode = #tpu.pipeline_mode<synchronous>, transform_indices = @transform_10, window_bounds = array<i64: 1, 128>}, {transform_indices = @transform_11, window_bounds = array<i64: 32, 128>}]} {
    %c0 = arith.constant 0 : index
    %c0_0 = arith.constant 0 : index
    %0 = vector.load %arg1[%c0, %c0_0] : memref<32x784xf32, #tpu.memory_space<vmem>>, vector<32x784xf32>
    %1 = arith.truncf %0 : vector<32x784xf32> to vector<32x784xbf16>
    %c0_1 = arith.constant 0 : index
    %c0_2 = arith.constant 0 : index
    %2 = vector.load %arg2[%c0_1, %c0_2] : memref<784x128xbf16, #tpu.memory_space<vmem>>, vector<784x128xbf16>
    %cst = arith.constant dense<0.000000e+00> : vector<32x128xf32>
    %3 = tpu.matmul %1, %2, %cst {dimension_numbers = #tpu.dot_dimension_numbers<[1], [0], [0], [1], [0, 0, 1, 1], [], []>} : vector<32x784xbf16>, vector<784x128xbf16>, vector<32x128xf32> -> vector<32x128xf32>
    %c0_3 = arith.constant 0 : index
    %c0_4 = arith.constant 0 : index
    %4 = vector.load %arg3[%c0_3, %c0_4] : memref<1x128xf32, #tpu.memory_space<vmem>>, vector<1x128xf32>
    %5 = vector.broadcast %4 : vector<1x128xf32> to vector<32x128xf32>
    %6 = arith.addf %3, %5 : vector<32x128xf32>
    %cst_5 = arith.constant 0.000000e+00 : f32
    %7 = vector.broadcast %cst_5 : f32 to vector<32x128xf32>
    %8 = arith.maximumf %6, %7 : vector<32x128xf32>
    %9 = arith.truncf %8 : vector<32x128xf32> to vector<32x128xbf16>
    %c0_6 = arith.constant 0 : index
    %c0_7 = arith.constant 0 : index
    %10 = vector.load %arg4[%c0_6, %c0_7] : memref<128x128xbf16, #tpu.memory_space<vmem>>, vector<128x128xbf16>
    %cst_8 = arith.constant dense<0.000000e+00> : vector<32x128xf32>
    %11 = tpu.matmul %9, %10, %cst_8 {dimension_numbers = #tpu.dot_dimension_numbers<[1], [0], [0], [1], [0, 0, 1, 1], [], []>} : vector<32x128xbf16>, vector<128x128xbf16>, vector<32x128xf32> -> vector<32x128xf32>
    %c0_9 = arith.constant 0 : index
    %c0_10 = arith.constant 0 : index
    %12 = vector.load %arg5[%c0_9, %c0_10] : memref<1x128xf32, #tpu.memory_space<vmem>>, vector<1x128xf32>
    %13 = vector.broadcast %12 : vector<1x128xf32> to vector<32x128xf32>
    %14 = arith.addf %11, %13 : vector<32x128xf32>
    %cst_11 = arith.constant 0.000000e+00 : f32
    %15 = vector.broadcast %cst_11 : f32 to vector<32x128xf32>
    %16 = arith.maximumf %14, %15 : vector<32x128xf32>
    %17 = arith.truncf %16 : vector<32x128xf32> to vector<32x128xbf16>
    %c0_12 = arith.constant 0 : index
    %c0_13 = arith.constant 0 : index
    %18 = vector.load %arg6[%c0_12, %c0_13] : memref<128x128xbf16, #tpu.memory_space<vmem>>, vector<128x128xbf16>
    %cst_14 = arith.constant dense<0.000000e+00> : vector<32x128xf32>
    %19 = tpu.matmul %17, %18, %cst_14 {dimension_numbers = #tpu.dot_dimension_numbers<[1], [0], [0], [1], [0, 0, 1, 1], [], []>} : vector<32x128xbf16>, vector<128x128xbf16>, vector<32x128xf32> -> vector<32x128xf32>
    %c0_15 = arith.constant 0 : index
    %c0_16 = arith.constant 0 : index
    %20 = vector.load %arg7[%c0_15, %c0_16] : memref<1x128xf32, #tpu.memory_space<vmem>>, vector<1x128xf32>
    %21 = vector.broadcast %20 : vector<1x128xf32> to vector<32x128xf32>
    %22 = arith.addf %19, %21 : vector<32x128xf32>
    %cst_17 = arith.constant 0.000000e+00 : f32
    %23 = vector.broadcast %cst_17 : f32 to vector<32x128xf32>
    %24 = arith.maximumf %22, %23 : vector<32x128xf32>
    %25 = arith.truncf %24 : vector<32x128xf32> to vector<32x128xbf16>
    %c0_18 = arith.constant 0 : index
    %c0_19 = arith.constant 0 : index
    %26 = vector.load %arg8[%c0_18, %c0_19] : memref<128x128xbf16, #tpu.memory_space<vmem>>, vector<128x128xbf16>
    %cst_20 = arith.constant dense<0.000000e+00> : vector<32x128xf32>
    %27 = tpu.matmul %25, %26, %cst_20 {dimension_numbers = #tpu.dot_dimension_numbers<[1], [0], [0], [1], [0, 0, 1, 1], [], []>} : vector<32x128xbf16>, vector<128x128xbf16>, vector<32x128xf32> -> vector<32x128xf32>
    %c0_21 = arith.constant 0 : index
    %c0_22 = arith.constant 0 : index
    %28 = vector.load %arg9[%c0_21, %c0_22] : memref<1x128xf32, #tpu.memory_space<vmem>>, vector<1x128xf32>
    %29 = vector.broadcast %28 : vector<1x128xf32> to vector<32x128xf32>
    %30 = arith.addf %27, %29 : vector<32x128xf32>
    %cst_23 = arith.constant 0.000000e+00 : f32
    %31 = vector.broadcast %cst_23 : f32 to vector<32x128xf32>
    %32 = arith.maximumf %30, %31 : vector<32x128xf32>
    %33 = arith.truncf %32 : vector<32x128xf32> to vector<32x128xbf16>
    %c0_24 = arith.constant 0 : index
    %c0_25 = arith.constant 0 : index
    %34 = vector.load %arg10[%c0_24, %c0_25] : memref<128x128xbf16, #tpu.memory_space<vmem>>, vector<128x128xbf16>
    %cst_26 = arith.constant dense<0.000000e+00> : vector<32x128xf32>
    %35 = tpu.matmul %33, %34, %cst_26 {dimension_numbers = #tpu.dot_dimension_numbers<[1], [0], [0], [1], [0, 0, 1, 1], [], []>} : vector<32x128xbf16>, vector<128x128xbf16>, vector<32x128xf32> -> vector<32x128xf32>
    %c0_27 = arith.constant 0 : index
    %c0_28 = arith.constant 0 : index
    %36 = vector.load %arg11[%c0_27, %c0_28] : memref<1x128xf32, #tpu.memory_space<vmem>>, vector<1x128xf32>
    %37 = vector.broadcast %36 : vector<1x128xf32> to vector<32x128xf32>
    %38 = arith.addf %35, %37 : vector<32x128xf32>
    %39 = arith.truncf %38 : vector<32x128xf32> to vector<32x128xbf16>
    %c0_29 = arith.constant 0 : index
    %c0_30 = arith.constant 0 : index
    %40 = vector.load %arg12[%c0_29, %c0_30] : memref<32x128xbf16, #tpu.memory_space<vmem>>, vector<32x128xbf16>
    tpu.vector_store %arg12[%c0_29, %c0_30], %39 {strides = array<i32>} : memref<32x128xbf16, #tpu.memory_space<vmem>>, vector<32x128xbf16>,
    return
  }
  func.func @transform_0(%arg0: i32) -> (i32, i32) {
    %c0_i32 = arith.constant 0 : i32
    %c0_i32_0 = arith.constant 0 : i32
    return %arg0, %c0_i32 : i32, i32
  }
  func.func @transform_1(%arg0: i32) -> (i32, i32) {
    %c0_i32 = arith.constant 0 : i32
    %c0_i32_0 = arith.constant 0 : i32
    %c0_i32_1 = arith.constant 0 : i32
    return %c0_i32, %c0_i32_0 : i32, i32
  }
  func.func @transform_2(%arg0: i32) -> (i32, i32) {
    %c0_i32 = arith.constant 0 : i32
    %c0_i32_0 = arith.constant 0 : i32
    %c0_i32_1 = arith.constant 0 : i32
    return %c0_i32, %c0_i32_0 : i32, i32
  }
  func.func @transform_3(%arg0: i32) -> (i32, i32) {
    %c0_i32 = arith.constant 0 : i32
    %c0_i32_0 = arith.constant 0 : i32
    %c0_i32_1 = arith.constant 0 : i32
    return %c0_i32, %c0_i32_0 : i32, i32
  }
  func.func @transform_4(%arg0: i32) -> (i32, i32) {
    %c0_i32 = arith.constant 0 : i32
    %c0_i32_0 = arith.constant 0 : i32
    %c0_i32_1 = arith.constant 0 : i32
    return %c0_i32, %c0_i32_0 : i32, i32
  }
  func.func @transform_5(%arg0: i32) -> (i32, i32) {
    %c0_i32 = arith.constant 0 : i32
    %c0_i32_0 = arith.constant 0 : i32
    %c0_i32_1 = arith.constant 0 : i32
    return %c0_i32, %c0_i32_0 : i32, i32
  }
  func.func @transform_6(%arg0: i32) -> (i32, i32) {
    %c0_i32 = arith.constant 0 : i32
    %c0_i32_0 = arith.constant 0 : i32
    %c0_i32_1 = arith.constant 0 : i32
    return %c0_i32, %c0_i32_0 : i32, i32
  }
  func.func @transform_7(%arg0: i32) -> (i32, i32) {
    %c0_i32 = arith.constant 0 : i32
    %c0_i32_0 = arith.constant 0 : i32
    %c0_i32_1 = arith.constant 0 : i32
    return %c0_i32, %c0_i32_0 : i32, i32
  }
  func.func @transform_8(%arg0: i32) -> (i32, i32) {
    %c0_i32 = arith.constant 0 : i32
    %c0_i32_0 = arith.constant 0 : i32
    %c0_i32_1 = arith.constant 0 : i32
    return %c0_i32, %c0_i32_0 : i32, i32
  }
  func.func @transform_9(%arg0: i32) -> (i32, i32) {
    %c0_i32 = arith.constant 0 : i32
    %c0_i32_0 = arith.constant 0 : i32
    %c0_i32_1 = arith.constant 0 : i32
    return %c0_i32, %c0_i32_0 : i32, i32
  }
  func.func @transform_10(%arg0: i32) -> (i32, i32) {
    %c0_i32 = arith.constant 0 : i32
    %c0_i32_0 = arith.constant 0 : i32
    %c0_i32_1 = arith.constant 0 : i32
    return %c0_i32, %c0_i32_0 : i32, i32
  }
  func.func @transform_11(%arg0: i32) -> (i32, i32) {
    %c0_i32 = arith.constant 0 : i32
    %c0_i32_0 = arith.constant 0 : i32
    return %arg0, %c0_i32 : i32, i32
  }
}

</mosaic_0001>

<bundles_post_ra>
// kernel: tpu_custom_call.1
= control target key start
LH: loop header
LB: loop body
LE: loop exit
PB: predicated region body
PF: predicated region fallthrough
CT: control target
= control target key end

     0   :  { %s3001_s0 = inlined_call_operand.hbm [shape: f32[64,784], index: 0, kind: input, shape index: {}]   ;;  %s3002_s1 = inlined_call_operand.hbm [shape: bf16[784,128], index: 1, kind: input, shape index: {}]   ;;  %s3003_s2 = inlined_call_operand.vmem [shape: f32[1,128], index: 2, kind: input, shape index: {}]   ;;  %s3004_s3 = inlined_call_operand.hbm [shape: bf16[128,128], index: 3, kind: input, shape index: {}]   ;;  %s3005_s4 = inlined_call_operand.vmem [shape: f32[1,128], index: 4, kind: input, shape index: {}]   ;;  %s3006_s5 = inlined_call_operand.hbm [shape: bf16[128,128], index: 5, kind: input, shape index: {}]   ;;  %s3007_s6 = inlined_call_operand.vmem [shape: f32[1,128], index: 6, kind: input, shape index: {}]   ;;  %s3008_s7 = inlined_call_operand.hbm [shape: bf16[128,128], index: 7, kind: input, shape index: {}]   ;;  %s3009_s8 = inlined_call_operand.vmem [shape: f32[1,128], index: 8, kind: input, shape index: {}]   ;;  %s3010_s9 = inlined_call_operand.hbm [shape: bf16[128,128], index: 9, kind: input, shape index: {}]   ;;  %s3011_s10 = inlined_call_operand.vmem [shape: f32[1,128], index: 10, kind: input, shape index: {}]   ;;  %s3012_s11 = inlined_call_operand.hbm [shape: bf16[64,128], index: 11, kind: output, shape index: {}]  }
   0x1   :  { %3017 = sst [smem:[#allocation19_spill]] %s3002_s1 }
   0x2   :  { %3018 = sst [smem:[#allocation20_spill]] %s3004_s3 }
   0x3   :  { %3019 = sst [smem:[#allocation21_spill]] %s3009_s8 }
   0x4   :  { %3020 = sst [smem:[#allocation22_spill]] %s3011_s10 }
   0x5   :  { %3021 = sst [smem:[#allocation23_spill]] %s3012_s11 }
   0x6   :  { %16 = vsyncpa [#allocation3], 0 }
   0x7   :  { %18 = vsyncpa [#allocation3 + $0x1], 0 }
   0x8   :  { %19 = vsyncpa [#allocation6], 0 }
   0x9   :  { %20 = vsyncpa [#allocation9], 0 }
   0xa   :  { %21 = vsyncpa [#allocation12], 0 }
   0xb   :  { %22 = vsyncpa [#allocation4], 0 }
   0xc   :  { %24 = vsyncpa [#allocation4 + $0x1], 0  ;;  %s2639_s17 = smov 0   ;;  %s2641_s18 = smov 0  }
   0xd   :  { %s2643_s19 = smov 0   ;;  %s2645_s20 = smov 0  }
   0xe LB: > { %s2566_s21 = smov [#allocation5]   ;;  %s2660_s23 = sadd.s32 4294967295, %s2564_s20   ;;  %s2564_s20 = sphi %s2645_s20, %s3048_s20   ;;  %s2560_s19 = sphi %s2643_s19, %s3047_s19   ;;  %s2556_s18 = sphi %s2641_s18, %s3046_s18   ;;  %s2552_s17 = sphi %s2639_s17, %s3045_s17  }
   0xf   : > { %s309_s22 = sshll.u32 %s2566_s21, 4  ;;  %p1786_p0 = scmp.ge.s32.totalorder %s2564_s20, 1  ;;  %s2665_s22 = int_to_ptr.vmem [resolvable:$true] %s309_s22 }
  0x10   : > { %p3014_p1 = scmp.eq.s32.totalorder %s2660_s23, 0  ;;  %p297_p2 = scmp.lt.s32.totalorder %s2564_s20, 3 }
  0x11   : > { %s2567_s25 = smov [#allocation8]   ;;  %s2568_s28 = smov [#allocation7]  }
  0x12   : > { %p2667_p3 = pnand %p1786_p0, %p297_p2  ;;  %s341_s26 = sshll.u32 %s2567_s25, 4  ;;  %s2680_s26 = int_to_ptr.vmem [resolvable:$true] %s341_s26 }
  0x13   : > { %s325_s29 = sshll.u32 %s2568_s28, 4  ;;  %s3024_s1 = sld [smem:[#allocation19_spill]]  ;;  %s2682_s29 = int_to_ptr.vmem [resolvable:$true] %s325_s29 }
  0x14   : > { %s3022_s24 = scalar_select %p2667_p3, 1, 0 }
  0x15   : > { %p2156_p5 = pneg %p2667_p3 }
  0x17   : > { %p2676_p6 = pnand %p2156_p5, %p3014_p1 }
  0x19   : > { %s2316_s13 = scalar_lea.hbm %s3024_s1, 6272  ;;  %p2692_p8 = pneg %p2676_p6 }
  0x1a   : > { %p2317_p7 = scmp.ne.s32.totalorder %s3024_s1, %s2316_s13  ;;  %p2323_p11 = scmp.lt.u32.totalorder %s2316_s13, %s3024_s1 }
  0x1c   : > { %p2319_p9 = pnand %p2692_p8, %p2317_p7 }
  0x1e   : > { %p2320_p10 = pneg %p2319_p9 }
  0x20   : > { %p2325_p12 = pnand %p2323_p11, %p2320_p10 }
  0x22   : > { %2328 = shalt.err (!%p2325_p12)
}
  0x23   : > { %s2329_s28 = scalar_lea.vmem %s2665_s22, 6272  ;;  %p2337_p5 = scmp.lt.s32.totalorder %s2665_s22, %s2665_s22 }
  0x24   : > { %p2330_p13 = scmp.ne.s32.totalorder %s2665_s22, %s2329_s28  ;;  %p2338_p4 = scmp.lt.s32.totalorder %s2329_s28, %s2329_s28 }
  0x26   : > { %p2332_p0 = pnand %p2330_p13, %p2692_p8  ;;  %p2339_p7 = por %p2338_p4, %p2337_p5 }
  0x28   : > { %p2333_p2 = pneg %p2332_p0 }
  0x2a   : > { %p2340_p9 = pnand %p2339_p7, %p2333_p2 }
  0x2c   : > { %2343 = shalt.err (!%p2340_p9)
}
  0x2d   : > { %s2569_s30 = smov 64   ;;  %s2570_s12 = smov 4  }
  0x2e   : > { %2159 = dma.hbm_to_vmem [thread:$0]  (!%p2676_p6), %s3024_s1, 6272, %s2665_s22, [#allocation6], %s2569_s30, %s2569_s30, %s2570_s12  }
  0x2f   : > { %s2344_s25 = scalar_lea.hbm %s3006_s5, 1024 }
  0x30   : > { %p2345_p4 = scmp.ne.s32.totalorder %s3006_s5, %s2344_s25  ;;  %p2351_p12 = scmp.lt.u32.totalorder %s2344_s25, %s3006_s5 }
  0x32   : > { %p2347_p10 = pnand %p2345_p4, %p2692_p8 }
  0x34   : > { %p2348_p11 = pneg %p2347_p10 }
  0x36   : > { %p2353_p13 = pnand %p2351_p12, %p2348_p11 }
  0x38   : > { %2356 = shalt.err (!%p2353_p13)
}
  0x39   : > { %s2357_s22 = scalar_lea.vmem %s2680_s26, 1024  ;;  %p2365_p7 = scmp.lt.s32.totalorder %s2680_s26, %s2680_s26 }
  0x3a   : > { %p2358_p0 = scmp.ne.s32.totalorder %s2680_s26, %s2357_s22  ;;  %p2366_p9 = scmp.lt.s32.totalorder %s2357_s22, %s2357_s22 }
  0x3c   : > { %p2360_p2 = pnand %p2358_p0, %p2692_p8  ;;  %p2367_p4 = por %p2366_p9, %p2365_p7 }
  0x3e   : > { %p2361_p5 = pneg %p2360_p2 }
  0x40   : > { %p2368_p10 = pnand %p2367_p4, %p2361_p5 }
  0x42   : > { %2371 = shalt.err (!%p2368_p10)
}
  0x43   : > { %2165 = dma.hbm_to_vmem [thread:$0]  (!%p2676_p6), %s3006_s5, 1024, %s2680_s26, [#allocation9], %s2569_s30, %s2569_s30, %s2570_s12  }
  0x44   : > { %s3026_s3 = sld [smem:[#allocation20_spill]] }
  0x4a   : > { %s2372_s14 = scalar_lea.hbm %s3026_s3, 1024 }
  0x4b   : > { %p2373_p11 = scmp.ne.s32.totalorder %s3026_s3, %s2372_s14  ;;  %p2379_p0 = scmp.lt.u32.totalorder %s2372_s14, %s3026_s3 }
  0x4d   : > { %p2375_p12 = pnand %p2373_p11, %p2692_p8 }
  0x4f   : > { %p2376_p13 = pneg %p2375_p12 }
  0x51   : > { %p2381_p2 = pnand %p2379_p0, %p2376_p13 }
  0x53   : > { %2384 = shalt.err (!%p2381_p2)
}
  0x54   : > { %s2385_s26 = scalar_lea.vmem %s2682_s29, 1024  ;;  %p2393_p4 = scmp.lt.s32.totalorder %s2682_s29, %s2682_s29 }
  0x55   : > { %p2386_p5 = scmp.ne.s32.totalorder %s2682_s29, %s2385_s26  ;;  %p2394_p10 = scmp.lt.s32.totalorder %s2385_s26, %s2385_s26 }
  0x57   : > { %p2388_p7 = pnand %p2386_p5, %p2692_p8  ;;  %p2395_p11 = por %p2394_p10, %p2393_p4 }
  0x59   : > { %p2389_p9 = pneg %p2388_p7 }
  0x5b   : > { %p2396_p12 = pnand %p2395_p11, %p2389_p9 }
  0x5d   : > { %2399 = shalt.err (!%p2396_p12)
}
  0x5e   : > { %2162 = dma.hbm_to_vmem [thread:$0]  (!%p2676_p6), %s3026_s3, 1024, %s2682_s29, [#allocation6], %s2569_s30, %s2569_s30, %s2570_s12  }
  0x5f   : > { %s2571_s10 = smov [#allocation10]   ;;  %s2572_s13 = smov [#allocation11]  }
  0x60   : > { %s357_s11 = sshll.u32 %s2571_s10, 4  ;;  %s373_s14 = sshll.u32 %s2572_s13, 4  ;;  %s358_s11 = int_to_ptr.vmem [resolvable:$true] %s357_s11  ;;  %s374_s14 = int_to_ptr.vmem [resolvable:$true] %s373_s14 }
  0x61   : > { %s2400_s25 = scalar_lea.hbm %s3008_s7, 1024 }
  0x62   : > { %p2401_p13 = scmp.ne.s32.totalorder %s3008_s7, %s2400_s25  ;;  %p2407_p5 = scmp.lt.u32.totalorder %s2400_s25, %s3008_s7 }
  0x64   : > { %p2403_p0 = pnand %p2401_p13, %p2692_p8 }
  0x66   : > { %p2404_p2 = pneg %p2403_p0 }
  0x68   : > { %p2409_p7 = pnand %p2407_p5, %p2404_p2 }
  0x6a   : > { %2412 = shalt.err (!%p2409_p7)
}
  0x6b   : > { %s2413_s29 = scalar_lea.vmem %s358_s11, 1024  ;;  %p2421_p11 = scmp.lt.s32.totalorder %s358_s11, %s358_s11 }
  0x6c   : > { %p2414_p9 = scmp.ne.s32.totalorder %s358_s11, %s2413_s29  ;;  %p2422_p12 = scmp.lt.s32.totalorder %s2413_s29, %s2413_s29 }
  0x6e   : > { %p2416_p4 = pnand %p2414_p9, %p2692_p8  ;;  %p2423_p1 = por %p2422_p12, %p2421_p11 }
  0x70   : > { %p2417_p10 = pneg %p2416_p4 }
  0x72   : > { %p2424_p3 = pnand %p2423_p1, %p2417_p10 }
  0x74   : > { %2427 = shalt.err (!%p2424_p3)
}
  0x75   : > { %2168 = dma.hbm_to_vmem [thread:$0]  (!%p2676_p6), %s3008_s7, 1024, %s358_s11, [#allocation9], %s2569_s30, %s2569_s30, %s2570_s12  }
  0x76   : > { %s2428_s15 = scalar_lea.hbm %s3010_s9, 1024 }
  0x77   : > { %p2429_p1 = scmp.ne.s32.totalorder %s3010_s9, %s2428_s15  ;;  %p2435_p0 = scmp.lt.u32.totalorder %s2428_s15, %s3010_s9 }
  0x79   : > { %p2431_p3 = pnand %p2429_p1, %p2692_p8 }
  0x7b   : > { %p2432_p13 = pneg %p2431_p3 }
  0x7d   : > { %p2437_p2 = pnand %p2435_p0, %p2432_p13 }
  0x7f   : > { %2440 = shalt.err (!%p2437_p2)
}
  0x80   : > { %s2441_s22 = scalar_lea.vmem %s374_s14, 1024  ;;  %p2449_p4 = scmp.lt.s32.totalorder %s374_s14, %s374_s14 }
  0x81   : > { %p2442_p5 = scmp.ne.s32.totalorder %s374_s14, %s2441_s22  ;;  %p2450_p10 = scmp.lt.s32.totalorder %s2441_s22, %s2441_s22 }
  0x83   : > { %p2444_p7 = pnand %p2442_p5, %p2692_p8  ;;  %p2451_p11 = por %p2450_p10, %p2449_p4 }
  0x85   : > { %p2445_p9 = pneg %p2444_p7 }
  0x87   : > { %p2452_p12 = pnand %p2451_p11, %p2445_p9 }
  0x89   : > { %2455 = shalt.err (!%p2452_p12)
}
  0x8a   : > { %2171 = dma.hbm_to_vmem [thread:$0]  (!%p2676_p6), %s3010_s9, 1024, %s374_s14, [#allocation12], %s2569_s30, %s2569_s30, %s2570_s12  }
  0x8b   : > { %s1785_s27 = sadd.s32 4294967294, %s2564_s20   ;;  %s2812_s16 = sadd.s32 1, %s2564_s20  }
  0x8c   : > { %s37_s1 = sadd.s32 1, %s2560_s19  ;;  %s34_s8 = ssub.s32 %s2564_s20, %s2812_s16 }
  0x8d   : > { %p44_p8 = scmp.ne.s32.totalorder %s2560_s19, %s2556_s18  ;;  %p35_p1 = scmp.eq.s32.totalorder %s34_s8, 0 }
  0x8e   : > { %p45_p3 = scmp.eq.s32.totalorder %s2564_s20, 0  ;;  %p50_p13 = scmp.ne.s32.totalorder %s2556_s18, %s2552_s17 }
  0x8f   : > { %p284_p0 = scmp.eq.s32.totalorder %s2660_s23, 1  ;;  %p3027_p5 = scmp.eq.s32.totalorder %s2660_s23, 0 }
  0x90   : > { %s2824_s10 = scalar_select %p35_p1, %s2560_s19, %s37_s1  }
  0x91   : > { %p46_p2 = por %p45_p3, %p44_p8  ;;  %p2828_p7 = por %p3027_p5, %p50_p13 }
  0x92   : > { %p2832_p6 = por %p284_p0, %p44_p8  ;;  %p290_p9 = scmp.eq.s32.totalorder %s1785_s27, 1 }
  0x93   : > { %p2185_p4 = scmp.lt.s32.totalorder %s2564_s20, 2  ;;  %s390_s12 = sand.u32 1, %s2560_s19  }
  0x94   : > { %s3029_s30 = scalar_select %p2832_p6, 1, 0 }
  0x95   : > { %p2838_p10 = por %p290_p9, %p50_p13  ;;  %s2129_s15 = smul.u32 224, %s390_s12 }
  0x96   : > { %p2842_p11 = pnand %p2185_p4, %p46_p2  ;;  %s2130_s25 = smul.u32 3584, %s2564_s20 }
  0x97   : > { %s3030_s14 = scalar_select %p2838_p10, 1, 0 }
  0x98   : > { %s2850_s22 = scalar_lea.hbm %s3001_s0, %s2130_s25  ;;  %s394_s11 = scalar_lea.vmem [#allocation2], %s2129_s15 }
  0x99   : > { %s402_s29 = sshll.u32 %s394_s11, 4  ;;  %s2854_s27 = scalar_lea.sflag [#allocation3], %s390_s12  ;;  %s2852_s29 = int_to_ptr.vmem [resolvable:$true] %s402_s29 }
  0x9a   : > { %s2456_s1 = scalar_lea.hbm %s2850_s22, 3584  ;;  %p2458_p8 = pneg %p2842_p11 }
  0x9b   : > { %p2457_p12 = scmp.ne.s32.totalorder %s2850_s22, %s2456_s1  ;;  %s2461_s28 = scalar_lea.hbm %s3001_s0, 7168 }
  0x9c   : > { %p2462_p13 = scmp.lt.u32.totalorder %s2850_s22, %s3001_s0  ;;  %p2463_p0 = scmp.lt.u32.totalorder %s2461_s28, %s2456_s1 }
  0x9d   : > { %p2459_p1 = pnand %p2458_p8, %p2457_p12  ;;  %p2465_p5 = scmp.lt.u32.totalorder %s2456_s1, %s2850_s22 }
  0x9e   : > { %p2464_p2 = por %p2463_p0, %p2462_p13 }
  0x9f   : > { %p2460_p3 = pneg %p2459_p1 }
  0xa0   : > { %p2466_p9 = por %p2465_p5, %p2464_p2 }
  0xa2   : > { %p2467_p4 = pnand %p2466_p9, %p2460_p3 }
  0xa4   : > { %2470 = shalt.err (!%p2467_p4)
}
  0xa5   : > { %s2471_s12 = scalar_lea.vmem %s2852_s29, 3584  ;;  %s2573_s15 = smov [#allocation2]  }
  0xa6   : > { %p2472_p12 = scmp.ne.s32.totalorder %s2852_s29, %s2471_s12  ;;  %s2476_s11 = sshll.u32 %s2573_s15, 4  ;;  %s2477_s11 = int_to_ptr.vmem [resolvable:$false] %s2476_s11 }
  0xa7   : > { %s2478_s3 = scalar_lea.vmem %s2477_s11, 7168  ;;  %p2479_p6 = scmp.lt.s32.totalorder %s2852_s29, %s2477_s11 }
  0xa8   : > { %p2474_p1 = pnand %p2472_p12, %p2458_p8  ;;  %p2480_p13 = scmp.lt.s32.totalorder %s2478_s3, %s2471_s12 }
  0xaa   : > { %p2475_p10 = pneg %p2474_p1  ;;  %p2481_p0 = por %p2480_p13, %p2479_p6 }
  0xac   : > { %p2482_p2 = pnand %p2481_p0, %p2475_p10 }
  0xae   : > { %2485 = shalt.err (!%p2482_p2)
}
  0xaf   : > { %s2574_s1 = smov 896   ;;  %s2575_s8 = smov 56  }
  0xb0   : > { %2175 = dma.hbm_to_vmem [thread:$0]  (!%p2842_p11), %s2850_s22, 3584, %s2852_s29, %s2854_s27, %s2574_s1, %s2574_s1, %s2575_s8  }
  0xb1   : > { %p3032_p8 = scmp.ne.s32.totalorder %s3022_s24, 0 }
  0xb2   : > { %s2885_s25 = sand.u32 (!%p3032_p8), 1, %s2556_s18  }
  0xb3   : > { %414 = sbr.rel (%p3032_p8) target bundleno = 1395 (0x573), region = 64  ;;  %s417_s26 = scalar_lea.sflag (!%p3032_p8), [#allocation3], %s2885_s25 }
  0xb4   : > { %s2131_s28 = smul.u32 (!%p3032_p8), 224, %s2885_s25 }
  0xb6   : > { %s2889_s12 = scalar_lea.vmem (!%p3032_p8), [#allocation2], %s2131_s28 }
  0xba   : > { %2531 = dma.done.wait (%p2828_p7), %s417_s26, 3584  }
  0xbb   : > { %2533 = vsyncadd (%p2828_p7), %s417_s26, 4294963712  ;;  %p3033_p6 = scmp.eq.s32.totalorder %s2660_s23, 0 }
  0xbd   : > { %2535 = dma.done.wait (%p3033_p6), [#allocation6], 7296   ;;  %p3034_p10 = pmov %p3033_p6 }
  0xbe   : > { %p3035_p11 = pmov %p3033_p6 }
  0xbf   : > { %2537 = vsyncadd (%p3034_p10), [#allocation6], 4294960000 }
  0xc0   : > { %2539 = dma.done.wait (%p3035_p11), [#allocation9], 2048   ;;  %p3036_p3 = pmov %p3033_p6 }
  0xc2   : > { %2541 = vsyncadd (%p3036_p3), [#allocation9], 4294965248  ;;  %p3037_p5 = pmov %p3036_p3 }
  0xc3   : > { %p3038_p9 = pmov %p3036_p3 }
  0xc4   : > { %2543 = dma.done.wait (%p3037_p5), [#allocation12], 1024  }
  0xc5   : > { %2545 = vsyncadd (%p3038_p9), [#allocation12], 4294966272  ;;  %v2235_v0 = vld [vmem:[#allocation5 + $0x40] sm:$0xff]   ;;  %v2239_v4 = vld [vmem:[#allocation5 + $0x48] sm:$0xff]   ;;  %vm923_vm0 = vcmask 130048   ;;  %s3039_s3 = sld [smem:[#allocation21_spill]] }
  0xc6   : > { %v2236_v1 = vld [vmem:[#allocation5] sm:$0xff]   ;;  %1916 = vmatprep.subr.bf16.mxu0 %v2235_v0  ;;  %v2240_v5 = vld [vmem:[#allocation5 + $0x8] sm:$0xff]   ;;  %v2243_v8 = vld [vmem:[#allocation5 + $0x50] sm:$0xff]   ;;  %s1802_s1 = sshll.u32 %s2885_s25, 4  ;;  %s3040_s26 = sld [smem:[#allocation22_spill]] }
  0xc7   : > { %v2237_v2 = vld [vmem:[#allocation5 + $0xc0] sm:$0xff]   ;;  %1917 = vmatpush3.bf16.msra.mxu0 %v2236_v1  ;;  %v2241_v6 = vld [vmem:[#allocation5 + $0xc8] sm:$0xff]   ;;  %v2244_v9 = vld [vmem:[#allocation5 + $0x10] sm:$0xff]   ;;  %s1904_s13 = sshll.u32 %s2660_s23, 8  ;;  %s3041_s29 = sld [smem:[#allocation23_spill]] }
  0xc8   : > { %v2238_v3 = vld [vmem:[#allocation5 + $0x80] sm:$0xff]   ;;  %1944 = vmatprep.subr.bf16.mxu1 %v2237_v2  ;;  %1918 = vmatprep.subr.bf16.mxu0 %v2239_v4  ;;  %v2242_v7 = vld [vmem:[#allocation5 + $0x88] sm:$0xff]   ;;  %v2245_v10 = vld [vmem:[#allocation5 + $0xd0] sm:$0xff]   ;;  %s1651_s15 = scalar_lea.sflag [#allocation4], %s2885_s25  ;;  %p3042_p4 = scmp.ne.s32.totalorder %s3029_s30, 0 }
  0xc9   : > { %1945 = vmatpush3.bf16.msra.mxu1 %v2238_v3  ;;  %v2246_v11 = vld [vmem:[#allocation5 + $0x90] sm:$0xff]   ;;  %v2247_v12 = vld [vmem:[#allocation5 + $0x58] sm:$0xff]   ;;  %v2251_v16 = vld [vmem:[#allocation5 + $0x60] sm:$0xff]   ;;  %s2576_s23 = smov [#allocation13]  }
  0xca   : > { %1946 = vmatprep.subr.bf16.mxu1 %v2241_v6  ;;  %v2248_v13 = vld [vmem:[#allocation5 + $0x18] sm:$0xff]   ;;  %v2252_v17 = vld [vmem:[#allocation5 + $0x20] sm:$0xff]   ;;  %v2255_v20 = vld [vmem:[#allocation5 + $0x68] sm:$0xff]  }
  0xcb   : > { %1919 = vmatpush3.bf16.msra.mxu0 %v2240_v5  ;;  %v2249_v14 = vld [vmem:[#allocation5 + $0xd8] sm:$0xff]   ;;  %v2253_v18 = vld [vmem:[#allocation5 + $0xe0] sm:$0xff]   ;;  %v2256_v21 = vld [vmem:[#allocation5 + $0x28] sm:$0xff]  }
  0xcc   : > { %1920 = vmatprep.subr.bf16.mxu0 %v2243_v8  ;;  %v2250_v15 = vld [vmem:[#allocation5 + $0x98] sm:$0xff]   ;;  %v2254_v19 = vld [vmem:[#allocation5 + $0xa0] sm:$0xff]   ;;  %v2257_v22 = vld [vmem:[#allocation5 + $0xe8] sm:$0xff]  }
  0xcd   : > { %1947 = vmatpush3.bf16.msra.mxu1 %v2242_v7  ;;  %v2258_v23 = vld [vmem:[#allocation5 + $0xa8] sm:$0xff]   ;;  %v2259_v24 = vld [vmem:[#allocation5 + $0x70] sm:$0xff]   ;;  %v2263_v28 = vld [vmem:[#allocation5 + $0x78] sm:$0xff]   ;;  %s2957_s27 = scalar_lea.hbm %s3041_s29, %s1904_s13 }
  0xce   : > { %1948 = vmatprep.subr.bf16.mxu1 %v2245_v10  ;;  %v2260_v25 = vld [vmem:[#allocation5 + $0x30] sm:$0xff]   ;;  %v2264_v29 = vld [vmem:[#allocation5 + $0x38] sm:$0xff]   ;;  %v483_v31 = vld [vmem:[%s2889_s12 + $0x8] sm:$0xff] }
  0xcf   : > { %1921 = vmatpush3.bf16.msra.mxu0 %v2244_v9  ;;  %v2261_v26 = vld [vmem:[#allocation5 + $0xf0] sm:$0xff]   ;;  %v2265_v30 = vld [vmem:[#allocation5 + $0xf8] sm:$0xff]   ;;  %v490_v32 = vld [vmem:[%s2889_s12 + $0x40] sm:$0xff] }
  0xd0   : > { %1922 = vmatprep.subr.bf16.mxu0 %v2247_v12  ;;  %v2262_v27 = vld [vmem:[#allocation5 + $0xb0] sm:$0xff]   ;;  %v511_v33 = vpack.c.bf16 %v490_v32, %v483_v31  ;;  %v2266_v34 = vld [vmem:[#allocation5 + $0xb8] sm:$0xff]   ;;  %v482_v35 = vld [vmem:[%s2889_s12] sm:$0xff] }
  0xd1   : > { %1949 = vmatpush3.bf16.msra.mxu1 %v2246_v11  ;;  %v489_v36 = vld [vmem:[%s2889_s12 + $0x38] sm:$0xff]  ;;  %v2267_v38 = vld [vmem:[#allocation5 + $0x140] sm:$0xff]   ;;  %v492_v40 = vld [vmem:[%s2889_s12 + $0x50] sm:$0xff] }
  0xd2   : > { %1950 = vmatprep.subr.bf16.mxu1 %v2249_v14  ;;  %962 = vmatprep.mubr.bf16.mxu0 %v511_v33  ;;  %v510_v37 = vpack.c.bf16 %v489_v36, %v482_v35  ;;  %v485_v39 = vld [vmem:[%s2889_s12 + $0x18] sm:$0xff]  ;;  %v2268_v42 = vld [vmem:[#allocation5 + $0x100] sm:$0xff]   ;;  %v484_v43 = vld [vmem:[%s2889_s12 + $0x10] sm:$0xff] }
  0xd3   : > { %1923 = vmatpush3.bf16.msra.mxu0 %v2248_v13  ;;  %v513_v41 = vpack.c.bf16 %v492_v40, %v485_v39  ;;  %v491_v44 = vld [vmem:[%s2889_s12 + $0x48] sm:$0xff]  ;;  %v2271_v48 = vld [vmem:[#allocation5 + $0x150] sm:$0xff]   ;;  %v2273_v50 = vld [vmem:[#allocation5 + $0x158] sm:$0xff]  }
  0xd4   : > { %1924 = vmatprep.subr.bf16.mxu0 %v2251_v16  ;;  %v512_v45 = vpack.c.bf16 %v491_v44, %v484_v43  ;;  %v2269_v46 = vld [vmem:[#allocation5 + $0x148] sm:$0xff]   ;;  %v2272_v49 = vld [vmem:[#allocation5 + $0x110] sm:$0xff]   ;;  %v2274_v51 = vld [vmem:[#allocation5 + $0x118] sm:$0xff]  }
  0xd5   : > { %1951 = vmatpush3.bf16.msra.mxu1 %v2250_v15  ;;  %1011 = vmatprep.mubr.bf16.mxu1 %v513_v41  ;;  %v2270_v47 = vld [vmem:[#allocation5 + $0x108] sm:$0xff]   ;;  %v497_v52 = vld [vmem:[%s2889_s12 + $0x78] sm:$0xff]  ;;  %v504_v53 = vld [vmem:[%s2889_s12 + $0xb0] sm:$0xff] }
  0xd6   : > { %1952 = vmatprep.subr.bf16.mxu1 %v2253_v18  ;;  %v2275_v54 = vld [vmem:[#allocation5 + $0x160] sm:$0xff]   ;;  %v518_v55 = vpack.c.bf16 %v504_v53, %v497_v52  ;;  %v496_v56 = vld [vmem:[%s2889_s12 + $0x70] sm:$0xff]  ;;  %v503_v57 = vld [vmem:[%s2889_s12 + $0xa8] sm:$0xff] }
  0xd7   : > { %1925 = vmatpush3.bf16.msra.mxu0 %v2252_v17  ;;  %v2276_v58 = vld [vmem:[#allocation5 + $0x120] sm:$0xff]   ;;  %v517_v59 = vpack.c.bf16 %v503_v57, %v496_v56  ;;  %v499_v60 = vld [vmem:[%s2889_s12 + $0x88] sm:$0xff]  ;;  %v505_v0 = vld [vmem:[%s2889_s12 + $0xb8] sm:$0xff] }
  0xd8   : > { %1926 = vmatprep.subr.bf16.mxu0 %v2255_v20  ;;  %v506_v61 = vld [vmem:[%s2889_s12 + $0xc0] sm:$0xff]  ;;  %v2277_v1 = vld [vmem:[#allocation5 + $0x168] sm:$0xff]   ;;  %v2279_v5 = vld [vmem:[#allocation5 + $0x170] sm:$0xff]  }
  0xd9   : > { %1953 = vmatpush3.bf16.msra.mxu1 %v2254_v19  ;;  %v498_v62 = vld [vmem:[%s2889_s12 + $0x80] sm:$0xff]  ;;  %v520_v63 = vpack.c.bf16 %v506_v61, %v499_v60  ;;  %v2278_v4 = vld [vmem:[#allocation5 + $0x128] sm:$0xff]   ;;  %v488_v9 = vld [vmem:[%s2889_s12 + $0x30] sm:$0xff] }
  0xda   : > { %1954 = vmatprep.subr.bf16.mxu1 %v2257_v22  ;;  %v519_v2 = vpack.c.bf16 %v505_v0, %v498_v62  ;;  %v2281_v3 = vld [vmem:[#allocation5 + $0x180] sm:$0xff]   ;;  %v487_v6 = vld [vmem:[%s2889_s12 + $0x28] sm:$0xff]  ;;  %v509_v12 = vld [vmem:[%s2889_s12 + $0xd8] sm:$0xff] }
  0xdb   : > { %1927 = vmatpush3.bf16.msra.mxu0 %v2256_v21  ;;  %v494_v7 = vld [vmem:[%s2889_s12 + $0x60] sm:$0xff]  ;;  %v495_v10 = vld [vmem:[%s2889_s12 + $0x68] sm:$0xff]  ;;  %v2280_v13 = vld [vmem:[#allocation5 + $0x130] sm:$0xff]  }
  0xdc   : > { %1928 = vmatprep.subr.bf16.mxu0 %v2259_v24  ;;  %v515_v8 = vpack.c.bf16 %v494_v7, %v487_v6  ;;  %v502_v11 = vld [vmem:[%s2889_s12 + $0xa0] sm:$0xff]  ;;  %v516_v14 = vpack.c.bf16 %v495_v10, %v488_v9  ;;  %v2282_v16 = vld [vmem:[#allocation5 + $0x178] sm:$0xff]   ;;  %v508_v21 = vld [vmem:[%s2889_s12 + $0xd0] sm:$0xff] }
  0xdd   : > { %1955 = vmatpush3.bf16.msra.mxu1 %v2258_v23  ;;  %v523_v15 = vpack.c.bf16 %v509_v12, %v502_v11  ;;  %v2283_v17 = vld [vmem:[#allocation5 + $0x138] sm:$0xff]   ;;  %v486_v18 = vld [vmem:[%s2889_s12 + $0x20] sm:$0xff]  ;;  %v500_v24 = vld [vmem:[%s2889_s12 + $0x90] sm:$0xff] }
  0xde   : > { %1956 = vmatprep.subr.bf16.mxu1 %v2261_v26  ;;  %v493_v19 = vld [vmem:[%s2889_s12 + $0x58] sm:$0xff]  ;;  %v2288_v31 = vld [vmem:[#allocation7 + $0x20] sm:$0xff]   ;;  %v2289_v32 = vld [vmem:[#allocation7 + $0x28] sm:$0xff]  }
  0xdf   : > { %1929 = vmatpush3.bf16.msra.mxu0 %v2260_v25  ;;  %v501_v20 = vld [vmem:[%s2889_s12 + $0x98] sm:$0xff]  ;;  %v514_v22 = vpack.c.bf16 %v493_v19, %v486_v18  ;;  %v507_v25 = vld [vmem:[%s2889_s12 + $0xc8] sm:$0xff]  ;;  %v2293_v36 = vld [vmem:[#allocation8 + $0x8] sm:$0xff]   ;;  %s478_s12 = scalar_lea.vmem [#allocation13], %s1802_s1 }
  0xe0   : > { %1930 = vmatprep.subr.bf16.mxu0 %v2263_v28  ;;  %v522_v23 = vpack.c.bf16 %v508_v21, %v501_v20  ;;  %v521_v26 = vpack.c.bf16 %v507_v25, %v500_v24  ;;  %v2285_v28 = vld [vmem:[#allocation7 + $0x8] sm:$0xff]   ;;  %v2290_v33 = vld [vmem:[#allocation7 + $0x30] sm:$0xff]   ;;  %v2292_v35 = vld [vmem:[#allocation8] sm:$0xff]   ;;  %s1664_s24 = sshll.u32 %s478_s12, 4  ;;  %s2952_s24 = int_to_ptr.vmem [resolvable:$true] %s1664_s24 }
  0xe1   : > { %1957 = vmatpush3.bf16.msra.mxu1 %v2262_v27  ;;  %v2284_v27 = vld [vmem:[#allocation7] sm:$0xff]   ;;  %v2297_v40 = vld [vmem:[#allocation8 + $0x28] sm:$0xff]   ;;  %s2486_s11 = scalar_lea.vmem %s2952_s24, 256 }
  0xe2   : > { %1958 = vmatprep.subr.bf16.mxu1 %v2265_v30  ;;  %v2287_v30 = vld [vmem:[#allocation7 + $0x18] sm:$0xff]   ;;  %v2296_v39 = vld [vmem:[#allocation8 + $0x20] sm:$0xff]   ;;  %p2487_p7 = scmp.ne.s32.totalorder %s2952_s24, %s2486_s11 }
  0xe3   : > { %1931 = vmatpush3.bf16.msra.mxu0 %v2264_v29  ;;  %v2286_v29 = vld [vmem:[#allocation7 + $0x10] sm:$0xff]  }
  0xe4   : > { %1972 = vmatprep.subr.bf16.mxu0 %v2267_v38  ;;  %v2295_v38 = vld [vmem:[#allocation8 + $0x18] sm:$0xff]   ;;  %p2488_p12 = pnand %p2487_p7, %p3042_p4 }
  0xe5   : > { %1959 = vmatpush3.bf16.msra.mxu1 %v2266_v34  ;;  %v2291_v34 = vld [vmem:[#allocation7 + $0x38] sm:$0xff]  }
  0xe6   : > { %963 = vmatmul.mubr.bf16.vlgmr.msra.gmra.mrb[0].mxu0 %v510_v37  ;;  %2043 = vmatprep.subr.bf16.mxu1 %v2281_v3  ;;  %v2294_v37 = vld [vmem:[#allocation8 + $0x10] sm:$0xff]   ;;  %p2489_p1 = pneg %p2488_p12 }
  0xe7   : > { %1973 = vmatpush3.bf16.msra.mxu0 %v2268_v42  ;;  %970 = vmatprep.mubr.bf16.mxu0 %v518_v55  ;;  %v1803_v42 = vld [vmem:[%s3003_s2] ss:$0 sm:$0xff] }
  0xe8   : > { %1012 = vmatmul.mubr.bf16.vlgmr.msra.gmra.mrb[0].mxu1 %v512_v45  ;;  %1974 = vmatprep.subr.bf16.mxu0 %v2269_v46 }
  0xe9   : > { %1019 = vmatprep.mubr.bf16.mxu1 %v520_v63  ;;  %2044 = vmatpush3.bf16.msra.mxu1 %v2281_v3 }
  0xea   : > { %2049 = vmatprep.subr.bf16.mxu1 %v2284_v27 }
  0xeb   : > { %1975 = vmatpush3.bf16.msra.mxu0 %v2270_v47 }
  0xec   : > { %1976 = vmatprep.subr.bf16.mxu0 %v2271_v48 }
  0xee   : > { %971 = vmatmul.mubr.bf16.gmra.mrb[4].mxu0 %v517_v59 }
  0xef   : > { %1977 = vmatpush3.bf16.msra.mxu0 %v2272_v49  ;;  %1060 = vmatprep.mubr.bf16.mxu0 %v515_v8 }
  0xf0   : > { %1978 = vmatprep.subr.bf16.mxu0 %v2273_v50  ;;  %1020 = vmatmul.mubr.bf16.gmra.mrb[4].mxu1 %v519_v2 }
  0xf1   : > { %2045 = vmatprep.mubr.msk.bf16.mxu1 %vm923_vm0, %v516_v14 }
  0xf3   : > { %1979 = vmatpush3.bf16.msra.mxu0 %v2274_v51 }
  0xf4   : > { %1980 = vmatprep.subr.bf16.mxu0 %v2275_v54 }
  0xf7   : > { %1981 = vmatpush3.bf16.msra.mxu0 %v2276_v58 }
  0xf8   : > { %1982 = vmatprep.subr.bf16.mxu0 %v2277_v1  ;;  %2046 = vmatmul.mubr.msk.bf16.vlgmr.msra.gmra.mrb[8].mxu1 %vm923_vm0, %v523_v15 }
  0xf9   : > { %2050 = vmatpush3.bf16.msra.mxu1 %v2284_v27 }
  0xfa   : > { %2051 = vmatprep.subr.bf16.mxu1 %v2285_v28 }
  0xfb   : > { %1983 = vmatpush3.bf16.msra.mxu0 %v2278_v4 }
  0xfc   : > { %1984 = vmatprep.subr.bf16.mxu0 %v2279_v5 }
  0xfd   : > { %2052 = vmatpush3.bf16.msra.mxu1 %v2285_v28 }
  0xfe   : > { %2053 = vmatprep.subr.bf16.mxu1 %v2286_v29 }
  0xff   : > { %1985 = vmatpush3.bf16.msra.mxu0 %v2280_v13 }
 0x100   : > { %1986 = vmatprep.subr.bf16.mxu0 %v2282_v16 }
 0x101   : > { %2054 = vmatpush3.bf16.msra.mxu1 %v2286_v29 }
 0x102   : > { %2055 = vmatprep.subr.bf16.mxu1 %v2287_v30 }
 0x103   : > { %1987 = vmatpush3.bf16.msra.mxu0 %v2283_v17 }
 0x104   : > { %2069 = vmatprep.subr.bf16.mxu0 %v2292_v35 }
 0x105   : > { %2056 = vmatpush3.bf16.msra.mxu1 %v2287_v30 }
 0x106   : > { %1061 = vmatmul.mubr.bf16.vlgmr.msra.gmra.mrb[8].mxu0 %v514_v22  ;;  %2057 = vmatprep.subr.bf16.mxu1 %v2288_v31 }
 0x107   : > { %1068 = vmatprep.mubr.bf16.mxu0 %v522_v23  ;;  %2070 = vmatpush3.bf16.msra.mxu0 %v2292_v35 }
 0x108   : > { %2071 = vmatprep.subr.bf16.mxu0 %v2293_v36 }
 0x109   : > { %2058 = vmatpush3.bf16.msra.mxu1 %v2288_v31 }
 0x10a   : > { %2059 = vmatprep.subr.bf16.mxu1 %v2289_v32 }
 0x10b   : > { %2072 = vmatpush3.bf16.msra.mxu0 %v2293_v36 }
 0x10c   : > { %2073 = vmatprep.subr.bf16.mxu0 %v2294_v37 }
 0x10d   : > { %2060 = vmatpush3.bf16.msra.mxu1 %v2289_v32 }
 0x10e   : > { %1069 = vmatmul.mubr.bf16.gmra.mrb[12].mxu0 %v521_v26  ;;  %2061 = vmatprep.subr.bf16.mxu1 %v2290_v33 }
 0x10f   : > { %2074 = vmatpush3.bf16.msra.mxu0 %v2294_v37 }
 0x110   : > { %2075 = vmatprep.subr.bf16.mxu0 %v2295_v38 }
 0x111   : > { %2062 = vmatpush3.bf16.msra.mxu1 %v2290_v33 }
 0x112   : > { %2063 = vmatprep.subr.bf16.mxu1 %v2291_v34 }
 0x113   : > { %2076 = vmatpush3.bf16.msra.mxu0 %v2295_v38 }
 0x114   : > { %2077 = vmatprep.subr.bf16.mxu0 %v2296_v39 }
 0x115   : > { %2064 = vmatpush3.bf16.msra.mxu1 %v2291_v34 }
 0x117   : > { %2078 = vmatpush3.bf16.msra.mxu0 %v2296_v39 }
 0x118   : > { %2079 = vmatprep.subr.bf16.mxu0 %v2297_v40 }
 0x11b   : > { %2080 = vmatpush3.bf16.msra.mxu0 %v2297_v40  ;;  %v2298_v40 = vld [vmem:[#allocation8 + $0x30] sm:$0xff]  }
 0x11c   : > { %2081 = vmatprep.subr.bf16.mxu0 %v2298_v40 }
 0x11f   : > { %2082 = vmatpush3.bf16.msra.mxu0 %v2298_v40  ;;  %v1882_v40 = vld [vmem:[%s3040_s26] ss:$0 sm:$0xff] }
 0x1b9   : > { %v1932_v41 = vpop.f32.mrb[0].mxu0 }
 0x1ba   : > { %v1933_v43 = vpop.f32.mrb[1].mxu0 }
 0x1bb   : > { %v1934_v44 = vadd.f32 %v1933_v43, %v1932_v41  ;;  %v1935_v45 = vpop.f32.mrb[2].mxu0  ;;  %v1960_v46 = vpop.f32.mrb[0].mxu1  ;;  %v2299_v41 = vld [vmem:[#allocation8 + $0x38] sm:$0xff]   ;;  %v2301_v43 = vld [vmem:[#allocation10 + $0x8] sm:$0xff]  }
 0x1bc   : > { %v1936_v47 = vpop.f32.mrb[3].mxu0  ;;  %v1961_v50 = vpop.f32.mrb[1].mxu1  ;;  %2083 = vmatprep.subr.bf16.mxu0 %v2299_v41 }
 0x1bd   : > { %v965_v48 = vadd.f32 %v1934_v44, %v1803_v42  ;;  %v1937_v49 = vadd.f32 %v1936_v47, %v1935_v45  ;;  %v1962_v51 = vadd.f32 %v1961_v50, %v1960_v46  ;;  %v1963_v52 = vpop.f32.mrb[2].mxu1  ;;  %2084 = vmatpush3.bf16.msra.mxu0 %v2299_v41  ;;  %v2302_v44 = vld [vmem:[#allocation10 + $0x10] sm:$0xff]   ;;  %v2303_v45 = vld [vmem:[#allocation10 + $0x18] sm:$0xff]   ;;  %v2304_v46 = vld [vmem:[#allocation10 + $0x20] sm:$0xff]  }
 0x1be   : > { %v1964_v54 = vpop.f32.mrb[3].mxu1  ;;  %v2305_v47 = vld [vmem:[#allocation10 + $0x28] sm:$0xff]  }
 0x1bf   : > { %v968_v53 = vadd.f32 %v1937_v49, %v1803_v42  ;;  %v1014_v55 = vadd.f32 %v1962_v51, %v965_v48  ;;  %v1965_v56 = vadd.f32 %v1964_v54, %v1963_v52  ;;  %v1855_v48 = vld [vmem:[%s3005_s4] ss:$0 sm:$0xff] }
 0x1c1   : > { %v1017_v57 = vadd.f32 %v1965_v56, %v968_v53  ;;  %v1938_v58 = vpop.f32.mrb[4].mxu0 }
 0x1c2   : > { %v1939_v59 = vpop.f32.mrb[5].mxu0 }
 0x1c3   : > { %v1940_v60 = vadd.f32 %v1939_v59, %v1938_v58  ;;  %v1941_v61 = vpop.f32.mrb[6].mxu0  ;;  %v1966_v62 = vpop.f32.mrb[4].mxu1 }
 0x1c4   : > { %v1942_v63 = vpop.f32.mrb[7].mxu0  ;;  %v1967_v0 = vpop.f32.mrb[5].mxu1 }
 0x1c5   : > { %v973_v1 = vadd.f32 %v1940_v60, %v1803_v42  ;;  %v1943_v2 = vadd.f32 %v1942_v63, %v1941_v61  ;;  %v1968_v3 = vadd.f32 %v1967_v0, %v1966_v62  ;;  %v1969_v4 = vpop.f32.mrb[6].mxu1  ;;  %v2306_v63 = vld [vmem:[#allocation10 + $0x30] sm:$0xff]   ;;  %v2307_v0 = vld [vmem:[#allocation10 + $0x38] sm:$0xff]  }
 0x1c6   : > { %v1970_v5 = vpop.f32.mrb[7].mxu1 }
 0x1c7   : > { %v976_v6 = vadd.f32 %v1943_v2, %v1803_v42  ;;  %v1022_v7 = vadd.f32 %v1968_v3, %v973_v1  ;;  %v1971_v8 = vadd.f32 %v1970_v5, %v1969_v4  ;;  %v2300_v42 = vld [vmem:[#allocation10] sm:$0xff]   ;;  %v2309_v2 = vld [vmem:[#allocation11 + $0x8] sm:$0xff]   ;;  %v2310_v3 = vld [vmem:[#allocation11 + $0x10] sm:$0xff]  }
 0x1c8   : > { %2089 = vmatprep.subr.bf16.mxu1 %v2300_v42  ;;  %v2308_v1 = vld [vmem:[#allocation11] sm:$0xff]   ;;  %v2311_v4 = vld [vmem:[#allocation11 + $0x18] sm:$0xff]  }
 0x1c9   : > { %v1025_v9 = vadd.f32 %v1971_v8, %v976_v6  ;;  %2109 = vmatprep.subr.bf16.mxu0 %v2308_v1  ;;  %v2312_v5 = vld [vmem:[#allocation11 + $0x20] sm:$0xff]   ;;  %v2313_v6 = vld [vmem:[#allocation11 + $0x28] sm:$0xff]  }
 0x1cb   : > { %v2047_v10 = vpop.f32.mrb[8].mxu1 }
 0x1cc   : > { %v1111_v11 = vpop.f32.mrb[9].mxu1 }
 0x1cd   : > { %v2048_v12 = vpop.f32.mrb[10].mxu1 }
 0x1ce   : > { %v1114_v13 = vpop.f32.mrb[11].mxu1 }
 0x1d9   : > { %v1988_v14 = vpop.f32.mrb[8].mxu0 }
 0x1da   : > { %v1989_v15 = vpop.f32.mrb[9].mxu0 }
 0x1db   : > { %v1990_v16 = vadd.f32 %v1989_v15, %v1988_v14  ;;  %v1991_v17 = vpop.f32.mrb[10].mxu0 }
 0x1dc   : > { %v1992_v18 = vpop.f32.mrb[11].mxu0 }
 0x1dd   : > { %v1993_v19 = vadd.f32 %v1992_v18, %v1991_v17  ;;  %v1063_v20 = vadd.f32 %v1990_v16, %v1014_v55 }
 0x1df   : > { %v1112_v21 = vadd.f32 %v1111_v11, %v1063_v20  ;;  %v1066_v22 = vadd.f32 %v1993_v19, %v1017_v57 }
 0x1e1   : > { %v1115_v23 = vadd.f32 %v1114_v13, %v1066_v22  ;;  %v1994_v24 = vpop.f32.mrb[12].mxu0  ;;  %v1126_v26 = vmax.f32 %v1112_v21, 0.0  ;;  %v2314_v22 = vld [vmem:[#allocation11 + $0x30] sm:$0xff]  }
 0x1e2   : > { %v1995_v25 = vpop.f32.mrb[13].mxu0 }
 0x1e3   : > { %v1127_v27 = vmax.f32 %v1115_v23, 0.0  ;;  %v1996_v28 = vadd.f32 %v1995_v25, %v1994_v24  ;;  %v1997_v29 = vpop.f32.mrb[14].mxu0  ;;  %v2315_v23 = vld [vmem:[#allocation11 + $0x38] sm:$0xff]  }
 0x1e4   : > { %v1998_v30 = vpop.f32.mrb[15].mxu0  ;;  %v1873_v24 = vld [vmem:[%s3039_s3] ss:$0 sm:$0xff]  ;;  %s2490_s3 = sshll.u32 %s2576_s23, 4  ;;  %s2491_s3 = int_to_ptr.vmem [resolvable:$false] %s2490_s3 }
 0x1e5   : > { %v1130_v31 = vpack.c.bf16 %v1127_v27, %v1126_v26  ;;  %v1071_v32 = vadd.f32 %v1996_v28, %v1022_v7  ;;  %v1999_v33 = vadd.f32 %v1998_v30, %v1997_v29  ;;  %v1864_v7 = vld [vmem:[%s3007_s6] ss:$0 sm:$0xff]  ;;  %s2492_s1 = scalar_lea.vmem %s2491_s3, 512  ;;  %p2493_p13 = scmp.lt.s32.totalorder %s2952_s24, %s2491_s3 }
 0x1e6   : > { %p2494_p0 = scmp.lt.s32.totalorder %s2492_s1, %s2486_s11 }
 0x1e7   : > { %v1120_v34 = vadd.f32 %v2047_v10, %v1071_v32  ;;  %v1074_v35 = vadd.f32 %v1999_v33, %v1025_v9  ;;  %2065 = vmatprep.mubr.bf16.mxu1 %v1130_v31 }
 0x1e8   : > { %p2495_p2 = por %p2494_p0, %p2493_p13 }
 0x1e9   : > { %v1123_v36 = vadd.f32 %v2048_v12, %v1074_v35  ;;  %v1128_v37 = vmax.f32 %v1120_v34, 0.0 }
 0x1ea   : > { %p2496_p8 = pnand %p2495_p2, %p2489_p1 }
 0x1eb   : > { %v1129_v38 = vmax.f32 %v1123_v36, 0.0 }
 0x1ed   : > { %v1131_v39 = vpack.c.bf16 %v1129_v38, %v1128_v37 }
 0x1ef   : > { %2066 = vmatmul.mubr.bf16.vlgmr.msra.gmra.mrb[12].mxu1 %v1131_v39 }
 0x1f0   : > { %2090 = vmatpush3.bf16.msra.mxu1 %v2300_v42 }
 0x1f1   : > { %2091 = vmatprep.subr.bf16.mxu1 %v2301_v43 }
 0x1f4   : > { %2092 = vmatpush3.bf16.msra.mxu1 %v2301_v43 }
 0x1f5   : > { %2093 = vmatprep.subr.bf16.mxu1 %v2302_v44 }
 0x1f8   : > { %2094 = vmatpush3.bf16.msra.mxu1 %v2302_v44 }
 0x1f9   : > { %2095 = vmatprep.subr.bf16.mxu1 %v2303_v45 }
 0x1fc   : > { %2096 = vmatpush3.bf16.msra.mxu1 %v2303_v45 }
 0x1fd   : > { %2097 = vmatprep.subr.bf16.mxu1 %v2304_v46 }
 0x200   : > { %2098 = vmatpush3.bf16.msra.mxu1 %v2304_v46 }
 0x201   : > { %2099 = vmatprep.subr.bf16.mxu1 %v2305_v47 }
 0x204   : > { %2100 = vmatpush3.bf16.msra.mxu1 %v2305_v47 }
 0x205   : > { %2101 = vmatprep.subr.bf16.mxu1 %v2306_v63 }
 0x208   : > { %2102 = vmatpush3.bf16.msra.mxu1 %v2306_v63 }
 0x209   : > { %2103 = vmatprep.subr.bf16.mxu1 %v2307_v0 }
 0x20c   : > { %2104 = vmatpush3.bf16.msra.mxu1 %v2307_v0 }
 0x2c2   : > { %v2067_v49 = vpop.f32.mrb[12].mxu1 }
 0x2c3   : > { %v1246_v50 = vadd.f32 %v2067_v49, %v1855_v48  ;;  %v1237_v51 = vpop.f32.mrb[13].mxu1 }
 0x2c4   : > { %v1238_v52 = vadd.f32 %v1855_v48, %v1237_v51  ;;  %v2068_v53 = vpop.f32.mrb[14].mxu1 }
 0x2c5   : > { %v1249_v54 = vadd.f32 %v2068_v53, %v1855_v48  ;;  %v1240_v55 = vpop.f32.mrb[15].mxu1  ;;  %v1254_v57 = vmax.f32 %v1246_v50, 0.0 }
 0x2c6   : > { %v1241_v56 = vadd.f32 %v1855_v48, %v1240_v55  ;;  %v1252_v59 = vmax.f32 %v1238_v52, 0.0 }
 0x2c7   : > { %v1255_v58 = vmax.f32 %v1249_v54, 0.0 }
 0x2c8   : > { %v1253_v60 = vmax.f32 %v1241_v56, 0.0 }
 0x2c9   : > { %v1257_v61 = vpack.c.bf16 %v1255_v58, %v1254_v57 }
 0x2ca   : > { %v1256_v62 = vpack.c.bf16 %v1253_v60, %v1252_v59 }
 0x2cc   : > { %2085 = vmatprep.mubr.bf16.mxu0 %v1256_v62 }
 0x2cd   : > { %2086 = vmatmul.mubr.bf16.vlgmr.msra.gmra.mrb[16].mxu0 %v1257_v61 }
 0x2ce   : > { %2110 = vmatpush3.bf16.msra.mxu0 %v2308_v1 }
 0x2cf   : > { %2111 = vmatprep.subr.bf16.mxu0 %v2309_v2 }
 0x2d2   : > { %2112 = vmatpush3.bf16.msra.mxu0 %v2309_v2 }
 0x2d3   : > { %2113 = vmatprep.subr.bf16.mxu0 %v2310_v3 }
 0x2d6   : > { %2114 = vmatpush3.bf16.msra.mxu0 %v2310_v3 }
 0x2d7   : > { %2115 = vmatprep.subr.bf16.mxu0 %v2311_v4 }
 0x2da   : > { %2116 = vmatpush3.bf16.msra.mxu0 %v2311_v4 }
 0x2db   : > { %2117 = vmatprep.subr.bf16.mxu0 %v2312_v5 }
 0x2de   : > { %2118 = vmatpush3.bf16.msra.mxu0 %v2312_v5 }
 0x2df   : > { %2119 = vmatprep.subr.bf16.mxu0 %v2313_v6 }
 0x2e2   : > { %2120 = vmatpush3.bf16.msra.mxu0 %v2313_v6 }
 0x2e3   : > { %2121 = vmatprep.subr.bf16.mxu0 %v2314_v22 }
 0x2e6   : > { %2122 = vmatpush3.bf16.msra.mxu0 %v2314_v22 }
 0x2e7   : > { %2123 = vmatprep.subr.bf16.mxu0 %v2315_v23 }
 0x2ea   : > { %2124 = vmatpush3.bf16.msra.mxu0 %v2315_v23 }
 0x3a0   : > { %v2087_v8 = vpop.f32.mrb[16].mxu0 }
 0x3a1   : > { %v1372_v9 = vadd.f32 %v2087_v8, %v1864_v7  ;;  %v1363_v10 = vpop.f32.mrb[17].mxu0 }
 0x3a2   : > { %v1364_v11 = vadd.f32 %v1864_v7, %v1363_v10  ;;  %v2088_v12 = vpop.f32.mrb[18].mxu0 }
 0x3a3   : > { %v1375_v13 = vadd.f32 %v2088_v12, %v1864_v7  ;;  %v1366_v14 = vpop.f32.mrb[19].mxu0  ;;  %v1380_v16 = vmax.f32 %v1372_v9, 0.0 }
 0x3a4   : > { %v1367_v15 = vadd.f32 %v1864_v7, %v1366_v14  ;;  %v1378_v18 = vmax.f32 %v1364_v11, 0.0 }
 0x3a5   : > { %v1381_v17 = vmax.f32 %v1375_v13, 0.0 }
 0x3a6   : > { %v1379_v19 = vmax.f32 %v1367_v15, 0.0 }
 0x3a7   : > { %v1383_v20 = vpack.c.bf16 %v1381_v17, %v1380_v16 }
 0x3a8   : > { %v1382_v21 = vpack.c.bf16 %v1379_v19, %v1378_v18 }
 0x3aa   : > { %2105 = vmatprep.mubr.bf16.mxu1 %v1382_v21 }
 0x3ab   : > { %2106 = vmatmul.mubr.bf16.vlgmr.msra.gmra.mrb[16].mxu1 %v1383_v20 }
 0x47e   : > { %v2107_v25 = vpop.f32.mrb[16].mxu1 }
 0x47f   : > { %v1498_v26 = vadd.f32 %v2107_v25, %v1873_v24  ;;  %v1489_v27 = vpop.f32.mrb[17].mxu1 }
 0x480   : > { %v1490_v28 = vadd.f32 %v1873_v24, %v1489_v27  ;;  %v2108_v29 = vpop.f32.mrb[18].mxu1 }
 0x481   : > { %v1501_v30 = vadd.f32 %v2108_v29, %v1873_v24  ;;  %v1492_v31 = vpop.f32.mrb[19].mxu1  ;;  %v1506_v33 = vmax.f32 %v1498_v26, 0.0 }
 0x482   : > { %v1493_v32 = vadd.f32 %v1873_v24, %v1492_v31  ;;  %v1504_v35 = vmax.f32 %v1490_v28, 0.0 }
 0x483   : > { %v1507_v34 = vmax.f32 %v1501_v30, 0.0 }
 0x484   : > { %v1505_v36 = vmax.f32 %v1493_v32, 0.0 }
 0x485   : > { %v1509_v37 = vpack.c.bf16 %v1507_v34, %v1506_v33 }
 0x486   : > { %v1508_v38 = vpack.c.bf16 %v1505_v36, %v1504_v35 }
 0x488   : > { %2125 = vmatprep.mubr.bf16.mxu0 %v1508_v38 }
 0x489   : > { %2126 = vmatmul.mubr.bf16.vlgmr.msra.gmra.mrb[20].mxu0 %v1509_v37 }
 0x55c   : > { %v2127_v39 = vpop.f32.mrb[20].mxu0 }
 0x55d   : > { %v1615_v41 = vpop.f32.mrb[21].mxu0  ;;  %v1624_v43 = vadd.f32 %v2127_v39, %v1882_v40 }
 0x55e   : > { %v2128_v42 = vpop.f32.mrb[22].mxu0  ;;  %v1616_v46 = vadd.f32 %v1882_v40, %v1615_v41 }
 0x55f   : > { %v1627_v44 = vadd.f32 %v2128_v42, %v1882_v40  ;;  %v1618_v45 = vpop.f32.mrb[23].mxu0 }
 0x560   : > { %v1619_v47 = vadd.f32 %v1882_v40, %v1618_v45 }
 0x561   : > { %v1913_v48 = vpack.c.bf16 %v1627_v44, %v1624_v43 }
 0x562   : > { %v1908_v49 = vpack.c.bf16 %v1619_v47, %v1616_v46 }
 0x563   : > { %1915 = vst [vmem:[%s478_s12 + $0x8] sm:$0xff] %v1913_v48  }
 0x564   : > { %1909 = vst [vmem:[%s478_s12] sm:$0xff] %v1908_v49  }
 0x565   : > { %2499 = shalt.err (!%p2496_p8)
}
 0x566   : > { %s2500_s8 = scalar_lea.hbm %s2957_s27, 256  ;;  %s2504_s12 = scalar_lea.hbm %s3041_s29, 512 }
 0x567   : > { %p2501_p6 = scmp.ne.s32.totalorder %s2957_s27, %s2500_s8  ;;  %p2505_p3 = scmp.lt.u32.totalorder %s2957_s27, %s3041_s29 }
 0x568   : > { %p2506_p5 = scmp.lt.u32.totalorder %s2504_s12, %s2500_s8  ;;  %p2508_p7 = scmp.lt.u32.totalorder %s2500_s8, %s2957_s27 }
 0x569   : > { %p2502_p10 = pnand %p2501_p6, %p3042_p4 }
 0x56a   : > { %p2507_p9 = por %p2506_p5, %p2505_p3 }
 0x56b   : > { %p2503_p11 = pneg %p2502_p10 }
 0x56c   : > { %p2509_p12 = por %p2508_p7, %p2507_p9 }
 0x56e   : > { %p2510_p1 = pnand %p2509_p12, %p2503_p11 }
 0x570   : > { %2513 = shalt.err (!%p2510_p1)
}
 0x571   : > { %s2577_s22 = smov 64   ;;  %s2578_s11 = smov 4  }
 0x572   : > { %2154 = dma.vmem_to_hbm [thread:$0]  (%p3042_p4), %s2952_s24, 256, %s2957_s27, %s1651_s15, %s2577_s22, %s2577_s22, %s2578_s11  }
 0x573 PF: > { %s1679_s23 = sand.u32 1, %s2552_s17   ;;  %p3043_p13 = scmp.ne.s32.totalorder %s3030_s14, 0 }
 0x574   : > { %p3044_p0 = scmp.ge.s32.totalorder %s2564_s20, 2  ;;  %s1680_s3 = scalar_lea.sflag [#allocation4], %s1679_s23 }
 0x576   : > { %p2177_p2 = pnand %p3044_p0, %p3043_p13 }
 0x578   : > { %2547 = dma.done.wait (!%p2177_p2), %s1680_s3, 256  }
 0x579   : > { %2549 = vsyncadd (!%p2177_p2), %s1680_s3, 4294967040  ;;  %p27_p8 = scmp.ge.s32.totalorder %s2812_s16, 4   ;;  %s3045_s17 = smov %s2556_s18 }
 0x57a   : > { %s3046_s18 = smov %s2560_s19  ;;  %s3047_s19 = smov %s2824_s10 }
 0x57b   : > { %s3048_s20 = smov %s2812_s16  ;;  %29 = sbr.rel (!%p27_p8) target bundleno = 14 (0xe), region = 129 }
 0x582   :  { %1685 = vsyncpa [#allocation3], 1 }
 0x583   :  { %1687 = vsyncpa [#allocation3 + $0x1], 1 }
 0x584   :  { %1688 = vsyncpa [#allocation6], 1 }
 0x585   :  { %1689 = vsyncpa [#allocation9], 1 }
 0x586   :  { %1690 = vsyncpa [#allocation12], 1 }
 0x587   :  { %1691 = vsyncpa [#allocation4], 1 }
 0x588   :  { %1693 = vsyncpa [#allocation4 + $0x1], 1 }

</bundles_post_ra>
